<compile_context>
chip_gen: v5e
topology: v5e:2x2
jax: 0.10.0
libtpu: 0.0.40
codegen_flags: <defaults>
</compile_context>

<pallas_src>
import functools

import jax
import jax.numpy as jnp
from jax.experimental import pallas as pl
from jax.experimental.pallas import tpu as pltpu

LEAKY_SLOPE = 0.01  # nn.LeakyReLU default negative_slope
LANE = 128
TILE_B_MAX = 128    # batch tile per grid step (keeps intermediates vreg-friendly)


def _round_up(n, m):
    return ((n + m - 1) // m) * m


def _leaky_relu(x):
    return jnp.where(x > 0, x, LEAKY_SLOPE * x)


def actor_kernel(x_ref, w1_ref, b1_ref, w2_ref, b2_ref, w3_ref, b3_ref, out_ref):
    """One batch tile of the fused MLP.

    Weights have constant block indices so they are DMA'd once and stay
    VMEM-resident across the batch grid.  Matmuls are bf16 on the MXU with
    f32 accumulation; the bias/LeakyReLU/tanh epilogue is f32 (v5e-safe) and
    the bf16 downcast is fused in so only the bf16 intermediate stays live.
    """
    # fc1 + LeakyReLU
    h = jnp.dot(x_ref[...], w1_ref[...], preferred_element_type=jnp.float32)
    h = _leaky_relu(h + b1_ref[...]).astype(jnp.bfloat16)

    # fc2 + LeakyReLU
    h = jnp.dot(h, w2_ref[...], preferred_element_type=jnp.float32)
    h = _leaky_relu(h + b2_ref[...]).astype(jnp.bfloat16)

    # fc3 + Tanh (output block is lane-dense: out dim padded to 128)
    y = jnp.dot(h, w3_ref[...], preferred_element_type=jnp.float32) + b3_ref[...]
    out_ref[...] = jnp.tanh(y).astype(out_ref.dtype)


def prepare_params(params):
    """One-time, outside the hot path.

    Zero-pads every hidden / output feature dim up to a multiple of 128 lanes
    (400->512, 300->384, action_size->128) so all matmul operands are
    lane-dense and bf16-sublane aligned, then casts weights to bf16 (halves
    the dominant weight-DMA bytes, full MXU rate).  Biases stay f32.  The
    padded rows/cols are all zeros so results are unchanged
    (leaky_relu(0)=0 feeds zero weight rows).
    """
    (w1, b1), (w2, b2), (w3, b3) = params
    s_in = w1.shape[0]
    h1, h2, n_out = w1.shape[1], w2.shape[1], w3.shape[1]
    h1p = _round_up(h1, LANE)       # 400 -> 512
    h2p = _round_up(h2, LANE)       # 300 -> 384
    n_pad = _round_up(n_out, LANE)  # e.g. 4 -> 128

    w1p = jnp.zeros((s_in, h1p), jnp.float32).at[:, :h1].set(w1)
    b1p = jnp.zeros((1, h1p), jnp.float32).at[:, :h1].set(b1)
    w2p = jnp.zeros((h1p, h2p), jnp.float32).at[:h1, :h2].set(w2)
    b2p = jnp.zeros((1, h2p), jnp.float32).at[:, :h2].set(b2)
    w3p = jnp.zeros((h2p, n_pad), jnp.float32).at[:h2, :n_out].set(w3)
    b3p = jnp.zeros((1, n_pad), jnp.float32).at[:, :n_out].set(b3)

    return (
        w1p.astype(jnp.bfloat16), b1p,
        w2p.astype(jnp.bfloat16), b2p,
        w3p.astype(jnp.bfloat16), b3p,
    )


@functools.partial(jax.jit, static_argnames=("action_size",))
def actor_forward(x, w1, b1, w2, b2, w3, b3, *, action_size):
    batch, state_size = x.shape
    h1p = w1.shape[1]
    h2p = w2.shape[1]
    n_pad = w3.shape[1]

    # Batch tiling: bf16-sublane aligned (multiple of 16), <= TILE_B_MAX rows,
    # and >= 2 grid steps once there is enough work so the "parallel" batch
    # axis shards across both v7x TensorCores (megacore on v6e).
    b_al = _round_up(batch, 16)
    tile_b = min(TILE_B_MAX, max(16, _round_up(pl.cdiv(b_al, 2), 16)))
    b_pad = _round_up(b_al, tile_b)
    grid = (b_pad // tile_b,)

    # Input cast to bf16 in the wrapper: halves the x-tile DMA and removes an
    # in-kernel VPU cast pass; matmul operand precision is unchanged.
    x = x.astype(jnp.bfloat16)
    if b_pad != batch:
        x = jnp.pad(x, ((0, b_pad - batch), (0, 0)))

    weight_bytes = (w1.size + w2.size + w3.size) * 2 + (b1.size + b2.size + b3.size) * 4
    act_bytes = b_pad * state_size * 2 + b_pad * n_pad * 4
    cost = pl.CostEstimate(
        flops=2 * b_pad * (state_size * h1p + h1p * h2p + h2p * n_pad),
        transcendentals=b_pad * n_pad,
        bytes_accessed=weight_bytes + act_bytes,
    )

    out = pl.pallas_call(
        actor_kernel,
        out_shape=jax.ShapeDtypeStruct((b_pad, n_pad), jnp.float32),
        grid_spec=pltpu.PrefetchScalarGridSpec(
            num_scalar_prefetch=0,
            grid=grid,
            in_specs=[
                pl.BlockSpec((tile_b, state_size), lambda b: (b, 0)),
                pl.BlockSpec(w1.shape, lambda b: (0, 0)),  # weights: constant index
                pl.BlockSpec(b1.shape, lambda b: (0, 0)),  # -> VMEM-resident
                pl.BlockSpec(w2.shape, lambda b: (0, 0)),
                pl.BlockSpec(b2.shape, lambda b: (0, 0)),
                pl.BlockSpec(w3.shape, lambda b: (0, 0)),
                pl.BlockSpec(b3.shape, lambda b: (0, 0)),
            ],
            out_specs=pl.BlockSpec((tile_b, n_pad), lambda b: (b, 0)),
        ),
        compiler_params=pltpu.CompilerParams(
            dimension_semantics=("parallel",),
        ),
        cost_estimate=cost,
    )(x, w1, b1, w2, b2, w3, b3)

    return out[:batch, :action_size]


def init_actor_params(key, state_size, action_size, hidden_units=(400, 300)):
    """Deterministic init mirroring layer_init():
       uniform(-lim, lim) with lim = 1/sqrt(weight.size(0)) == 1/sqrt(out_features),
       scaled by w_scale, bias = 0. Weights stored as (in, out), fp32."""
    params = []
    prev = state_size
    sizes = list(hidden_units) + [action_size]
    scales = [1.0] * len(hidden_units) + [0.003]
    for out_features, w_scale in zip(sizes, scales):
        key, sub = jax.random.split(key)
        lim = 1.0 / jnp.sqrt(jnp.float32(out_features))
        w = jax.random.uniform(
            sub, (prev, out_features), jnp.float32, minval=-lim, maxval=lim
        ) * w_scale
        b = jnp.zeros((1, out_features), jnp.float32)
        params.append((w, b))
        prev = out_features
    return params


def reference_forward(x, params):
    h = x
    for i, (w, b) in enumerate(params):
        h = h @ w + b
        if i < len(params) - 1:
            h = jnp.where(h > 0, h, LEAKY_SLOPE * h)
        else:
            h = jnp.tanh(h)
    return h


if __name__ == "__main__":
    state_size = 16
    action_size = 4
    hidden_units = (400, 300)
    batch = 8

    key = jax.random.PRNGKey(0)
    key, xkey = jax.random.split(key)
    x = jax.random.normal(xkey, (batch, state_size), jnp.float32)

    params = init_actor_params(key, state_size, action_size, hidden_units)
    w1, b1, w2, b2, w3, b3 = prepare_params(params)

    out = actor_forward(x, w1, b1, w2, b2, w3, b3, action_size=action_size)
    out = jax.block_until_ready(out)

    ref = reference_forward(x, params)  # fp32 reference
    assert out.shape == (batch, action_size)
    # bf16 matmul inputs -> loosened tolerance vs. fp32 reference
    assert jnp.allclose(out, ref, atol=1e-3, rtol=2e-2), "mismatch vs reference"

    print("KERNEL_OK")
</pallas_src>

<mosaic_0001>
module attributes {stable_mosaic.version = 11 : i64} {
  func.func @actor_kernel(%arg0: i32, %arg1: memref<16x16xbf16, #tpu.memory_space<vmem>>, %arg2: memref<16x512xbf16, #tpu.memory_space<vmem>>, %arg3: memref<1x512xf32, #tpu.memory_space<vmem>>, %arg4: memref<512x384xbf16, #tpu.memory_space<vmem>>, %arg5: memref<1x384xf32, #tpu.memory_space<vmem>>, %arg6: memref<384x128xbf16, #tpu.memory_space<vmem>>, %arg7: memref<1x128xf32, #tpu.memory_space<vmem>>, %arg8: memref<16x128xf32, #tpu.memory_space<vmem>>) attributes {dimension_semantics = [#tpu.dimension_semantics<parallel>], iteration_bounds = array<i64: 1>, scalar_prefetch = 0 : i64, scratch_operands = 0 : i64, tpu.core_type = #tpu.core_type<tc>, window_params = [{transform_indices = @transform_0, window_bounds = array<i64: 16, 16>}, {pipeline_mode = #tpu.pipeline_mode<synchronous>, transform_indices = @transform_1, window_bounds = array<i64: 16, 512>}, {pipeline_mode = #tpu.pipeline_mode<synchronous>, transform_indices = @transform_2, window_bounds = array<i64: 1, 512>}, {pipeline_mode = #tpu.pipeline_mode<synchronous>, transform_indices = @transform_3, window_bounds = array<i64: 512, 384>}, {pipeline_mode = #tpu.pipeline_mode<synchronous>, transform_indices = @transform_4, window_bounds = array<i64: 1, 384>}, {pipeline_mode = #tpu.pipeline_mode<synchronous>, transform_indices = @transform_5, window_bounds = array<i64: 384, 128>}, {pipeline_mode = #tpu.pipeline_mode<synchronous>, transform_indices = @transform_6, window_bounds = array<i64: 1, 128>}, {transform_indices = @transform_7, window_bounds = array<i64: 16, 128>}]} {
    %c0 = arith.constant 0 : index
    %c0_0 = arith.constant 0 : index
    %0 = vector.load %arg1[%c0, %c0_0] : memref<16x16xbf16, #tpu.memory_space<vmem>>, vector<16x16xbf16>
    %c0_1 = arith.constant 0 : index
    %c0_2 = arith.constant 0 : index
    %1 = vector.load %arg2[%c0_1, %c0_2] : memref<16x512xbf16, #tpu.memory_space<vmem>>, vector<16x512xbf16>
    %cst = arith.constant dense<0.000000e+00> : vector<16x512xf32>
    %2 = tpu.matmul %0, %1, %cst {dimension_numbers = #tpu.dot_dimension_numbers<[1], [0], [0], [1], [0, 0, 1, 1], [], []>} : vector<16x16xbf16>, vector<16x512xbf16>, vector<16x512xf32> -> vector<16x512xf32>
    %c0_3 = arith.constant 0 : index
    %c0_4 = arith.constant 0 : index
    %3 = vector.load %arg3[%c0_3, %c0_4] : memref<1x512xf32, #tpu.memory_space<vmem>>, vector<1x512xf32>
    %4 = vector.broadcast %3 : vector<1x512xf32> to vector<16x512xf32>
    %5 = arith.addf %2, %4 : vector<16x512xf32>
    %cst_5 = arith.constant 0.000000e+00 : f32
    %6 = vector.broadcast %cst_5 : f32 to vector<16x512xf32>
    %7 = arith.cmpf ogt, %5, %6 : vector<16x512xf32>
    %cst_6 = arith.constant 0.00999999977 : f32
    %8 = vector.broadcast %cst_6 : f32 to vector<16x512xf32>
    %9 = arith.mulf %8, %5 : vector<16x512xf32>
    %10 = arith.select %7, %5, %9 : vector<16x512xi1>, vector<16x512xf32>
    %11 = arith.truncf %10 : vector<16x512xf32> to vector<16x512xbf16>
    %c0_7 = arith.constant 0 : index
    %c0_8 = arith.constant 0 : index
    %12 = vector.load %arg4[%c0_7, %c0_8] : memref<512x384xbf16, #tpu.memory_space<vmem>>, vector<512x384xbf16>
    %cst_9 = arith.constant dense<0.000000e+00> : vector<16x384xf32>
    %13 = tpu.matmul %11, %12, %cst_9 {dimension_numbers = #tpu.dot_dimension_numbers<[1], [0], [0], [1], [0, 0, 1, 1], [], []>} : vector<16x512xbf16>, vector<512x384xbf16>, vector<16x384xf32> -> vector<16x384xf32>
    %c0_10 = arith.constant 0 : index
    %c0_11 = arith.constant 0 : index
    %14 = vector.load %arg5[%c0_10, %c0_11] : memref<1x384xf32, #tpu.memory_space<vmem>>, vector<1x384xf32>
    %15 = vector.broadcast %14 : vector<1x384xf32> to vector<16x384xf32>
    %16 = arith.addf %13, %15 : vector<16x384xf32>
    %cst_12 = arith.constant 0.000000e+00 : f32
    %17 = vector.broadcast %cst_12 : f32 to vector<16x384xf32>
    %18 = arith.cmpf ogt, %16, %17 : vector<16x384xf32>
    %cst_13 = arith.constant 0.00999999977 : f32
    %19 = vector.broadcast %cst_13 : f32 to vector<16x384xf32>
    %20 = arith.mulf %19, %16 : vector<16x384xf32>
    %21 = arith.select %18, %16, %20 : vector<16x384xi1>, vector<16x384xf32>
    %22 = arith.truncf %21 : vector<16x384xf32> to vector<16x384xbf16>
    %c0_14 = arith.constant 0 : index
    %c0_15 = arith.constant 0 : index
    %23 = vector.load %arg6[%c0_14, %c0_15] : memref<384x128xbf16, #tpu.memory_space<vmem>>, vector<384x128xbf16>
    %cst_16 = arith.constant dense<0.000000e+00> : vector<16x128xf32>
    %24 = tpu.matmul %22, %23, %cst_16 {dimension_numbers = #tpu.dot_dimension_numbers<[1], [0], [0], [1], [0, 0, 1, 1], [], []>} : vector<16x384xbf16>, vector<384x128xbf16>, vector<16x128xf32> -> vector<16x128xf32>
    %c0_17 = arith.constant 0 : index
    %c0_18 = arith.constant 0 : index
    %25 = vector.load %arg7[%c0_17, %c0_18] : memref<1x128xf32, #tpu.memory_space<vmem>>, vector<1x128xf32>
    %26 = vector.broadcast %25 : vector<1x128xf32> to vector<16x128xf32>
    %27 = arith.addf %24, %26 : vector<16x128xf32>
    %28 = math.tanh %27 : vector<16x128xf32>
    %c0_19 = arith.constant 0 : index
    %c0_20 = arith.constant 0 : index
    %29 = vector.load %arg8[%c0_19, %c0_20] : memref<16x128xf32, #tpu.memory_space<vmem>>, vector<16x128xf32>
    tpu.vector_store %arg8[%c0_19, %c0_20], %28 {strides = array<i32>} : memref<16x128xf32, #tpu.memory_space<vmem>>, vector<16x128xf32>,
    return
  }
  func.func @transform_0(%arg0: i32) -> (i32, i32) {
    %c0_i32 = arith.constant 0 : i32
    %c0_i32_0 = arith.constant 0 : i32
    return %arg0, %c0_i32 : i32, i32
  }
  func.func @transform_1(%arg0: i32) -> (i32, i32) {
    %c0_i32 = arith.constant 0 : i32
    %c0_i32_0 = arith.constant 0 : i32
    %c0_i32_1 = arith.constant 0 : i32
    return %c0_i32, %c0_i32_0 : i32, i32
  }
  func.func @transform_2(%arg0: i32) -> (i32, i32) {
    %c0_i32 = arith.constant 0 : i32
    %c0_i32_0 = arith.constant 0 : i32
    %c0_i32_1 = arith.constant 0 : i32
    return %c0_i32, %c0_i32_0 : i32, i32
  }
  func.func @transform_3(%arg0: i32) -> (i32, i32) {
    %c0_i32 = arith.constant 0 : i32
    %c0_i32_0 = arith.constant 0 : i32
    %c0_i32_1 = arith.constant 0 : i32
    return %c0_i32, %c0_i32_0 : i32, i32
  }
  func.func @transform_4(%arg0: i32) -> (i32, i32) {
    %c0_i32 = arith.constant 0 : i32
    %c0_i32_0 = arith.constant 0 : i32
    %c0_i32_1 = arith.constant 0 : i32
    return %c0_i32, %c0_i32_0 : i32, i32
  }
  func.func @transform_5(%arg0: i32) -> (i32, i32) {
    %c0_i32 = arith.constant 0 : i32
    %c0_i32_0 = arith.constant 0 : i32
    %c0_i32_1 = arith.constant 0 : i32
    return %c0_i32, %c0_i32_0 : i32, i32
  }
  func.func @transform_6(%arg0: i32) -> (i32, i32) {
    %c0_i32 = arith.constant 0 : i32
    %c0_i32_0 = arith.constant 0 : i32
    %c0_i32_1 = arith.constant 0 : i32
    return %c0_i32, %c0_i32_0 : i32, i32
  }
  func.func @transform_7(%arg0: i32) -> (i32, i32) {
    %c0_i32 = arith.constant 0 : i32
    %c0_i32_0 = arith.constant 0 : i32
    return %arg0, %c0_i32 : i32, i32
  }
}

</mosaic_0001>

<bundles_post_ra>
// kernel: actor_forward.1
= control target key start
LH: loop header
LB: loop body
LE: loop exit
PB: predicated region body
PF: predicated region fallthrough
CT: control target
= control target key end

     0   :  { %12 = vsyncpa [#allocation3], 0  ;;  %s2125_s0 = inlined_call_operand.vmem [shape: bf16[16,16], index: 0, kind: input, shape index: {}]   ;;  %s2126_s1 = inlined_call_operand.hbm [shape: bf16[16,512], index: 1, kind: input, shape index: {}]   ;;  %s2127_s2 = inlined_call_operand.vmem [shape: f32[1,512], index: 2, kind: input, shape index: {}]   ;;  %s2128_s3 = inlined_call_operand.hbm [shape: bf16[512,384], index: 3, kind: input, shape index: {}]   ;;  %s2129_s4 = inlined_call_operand.vmem [shape: f32[1,384], index: 4, kind: input, shape index: {}]   ;;  %s2130_s5 = inlined_call_operand.hbm [shape: bf16[384,128], index: 5, kind: input, shape index: {}]   ;;  %s2131_s6 = inlined_call_operand.vmem [shape: f32[1,128], index: 6, kind: input, shape index: {}]   ;;  %s2132_s7 = inlined_call_operand.vmem [shape: f32[16,128], index: 7, kind: output, shape index: {}]  }
   0x1   :  { %13 = vsyncpa [#allocation5], 0  ;;  %s35_s26 = sshll.u32 %s2128_s3, 4  ;;  %s2007_s27 = smov [#allocation4]   ;;  %s36_s26 = int_to_ptr.hbm [resolvable:$true] %s35_s26 }
   0x2   :  { %s37_s28 = sshll.u32 %s2007_s27, 4  ;;  %s20_s8 = sshll.u32 %s2126_s1, 4  ;;  %s38_s28 = int_to_ptr.vmem [resolvable:$true] %s37_s28  ;;  %s21_s8 = int_to_ptr.hbm [resolvable:$true] %s20_s8 }
   0x3   :  { %s2008_s9 = smov 192   ;;  %s2009_s10 = smov 12  }
   0x4   :  { %43 = dma.hbm_to_vmem [thread:$0]  %s36_s26, 12288, %s38_s28, [#allocation5], %s2008_s9, %s2008_s9, %s2009_s10  }
   0x5   :  { %s2010_s11 = smov [#allocation2]   ;;  %s2011_s13 = smov 256  }
   0x6   :  { %s22_s12 = sshll.u32 %s2010_s11, 4  ;;  %s2012_s14 = smov 16   ;;  %s23_s12 = int_to_ptr.vmem [resolvable:$true] %s22_s12 }
   0x7   :  { %28 = dma.hbm_to_vmem [thread:$0]  %s21_s8, 512, %s23_s12, [#allocation3], %s2011_s13, %s2011_s13, %s2012_s14  }
   0x8   :  { %s50_s16 = sshll.u32 %s2130_s5, 4  ;;  %s2013_s17 = smov [#allocation6]   ;;  %s51_s16 = int_to_ptr.hbm [resolvable:$true] %s50_s16 }
   0x9   :  { %s52_s18 = sshll.u32 %s2013_s17, 4  ;;  %s2014_s19 = smov 64   ;;  %s53_s18 = int_to_ptr.vmem [resolvable:$true] %s52_s18 }
   0xa   :  { %s2015_s1 = smov 4  }
   0xb   :  { %58 = dma.hbm_to_vmem [thread:$0]  %s51_s16, 3072, %s53_s18, [#allocation5], %s2014_s19, %s2014_s19, %s2015_s1  }
   0xc   :  { %2003 = dma.done.wait [#allocation3], 512  }
   0xd   :  { %2004 = vsyncadd [#allocation3], 4294966784 }
   0xe   :  { %2005 = dma.done.wait [#allocation5], 15360  }
   0xf   :  { %2006 = vsyncadd [#allocation5], 4294951936  ;;  %v1294_v0 = vld [vmem:[#allocation2] sm:$0xf]  ;;  %v1795_v1 = vld [vmem:[#allocation2 + $0xc] sm:$0xf0] }
  0x10   :  { %v1793_v2 = vld [vmem:[#allocation2 + $0x4] sm:$0xf]  ;;  %v1295_v3 = vor.u32 %v1795_v1, %v1294_v0  ;;  %v1296_v4 = vld [vmem:[#allocation2 + $0x10] sm:$0xf0]  ;;  %v1302_v5 = vld [vmem:[#allocation2 + $0x8] sm:$0xf] }
  0x11   :  { %v1796_v6 = vld [vmem:[#allocation2 + $0x14] sm:$0xf0]  ;;  %v1299_v7 = vor.u32 %v1793_v2, %v1296_v4  ;;  %v2068_v9 = vld [vmem:[%s2125_s0] sm:$0xff]  ;;  %vm115_vm0 = vcmask 130048   ;;  %v1794_v10 = vld [vmem:[#allocation2 + $0xc] sm:$0xf] }
  0x12   :  { %v1303_v8 = vor.u32 %v1796_v6, %v1302_v5  ;;  %v1304_v11 = vld [vmem:[#allocation2 + $0x18] sm:$0xf0]  ;;  %126 = vmatpush.bf16.msra.mxu3 %v1295_v3  ;;  %v1494_v13 = vld [vmem:[#allocation4 + $0x168] sm:$0xf]  ;;  %v1843_v14 = vld [vmem:[#allocation4 + $0x170] sm:$0xf0] }
  0x13   :  { %v1307_v12 = vor.u32 %v1794_v10, %v1304_v11  ;;  %v1482_v15 = vld [vmem:[#allocation4 + $0x150] sm:$0xf]  ;;  %140 = vmatpush.bf16.msra.mxu1 %v1299_v7  ;;  %v1495_v16 = vor.u32 %v1843_v14, %v1494_v13  ;;  %v1840_v17 = vld [vmem:[#allocation4 + $0x158] sm:$0xf0]  ;;  %v1398_v18 = vld [vmem:[#allocation4 + $0xa8] sm:$0xf] }
  0x14   :  { %154 = vmatpush.bf16.msra.mxu2 %v1303_v8  ;;  %v1819_v19 = vld [vmem:[#allocation4 + $0xb0] sm:$0xf0]  ;;  %v1590_v21 = vld [vmem:[#allocation4 + $0x228] sm:$0xf]  ;;  %v1483_v23 = vor.u32 %v1840_v17, %v1482_v15  ;;  %v1470_v25 = vld [vmem:[#allocation4 + $0x138] sm:$0xf] }
  0x15   :  { %v1399_v20 = vor.u32 %v1819_v19, %v1398_v18  ;;  %v1867_v22 = vld [vmem:[#allocation4 + $0x230] sm:$0xf0]  ;;  %1308 = vmatmul.msk.bf16.vlgmr.msra.gmra.mxu3 %vm115_vm0, %v2068_v9  ;;  %v1386_v26 = vld [vmem:[#allocation4 + $0x90] sm:$0xf]  ;;  %v1816_v27 = vld [vmem:[#allocation4 + $0x98] sm:$0xf0] }
  0x16   :  { %168 = vmatpush.bf16.msrb.mxu3 %v1307_v12  ;;  %v1591_v24 = vor.u32 %v1867_v22, %v1590_v21  ;;  %1309 = vmatmul.msk.bf16.vlgmr.msra.gmra.mxu1 %vm115_vm0, %v2068_v9  ;;  %v1837_v28 = vld [vmem:[#allocation4 + $0x140] sm:$0xf0]  ;;  %v1578_v29 = vld [vmem:[#allocation4 + $0x210] sm:$0xf]  ;;  %v1864_v30 = vld [vmem:[#allocation4 + $0x218] sm:$0xf0]  ;;  %v1387_v31 = vor.u32 %v1816_v27, %v1386_v26 }
  0x17   :  { %865 = vmatpush.bf16.msrb.mxu1 %v1495_v16  ;;  %1310 = vmatmul.msk.bf16.vlgmr.msra.gmra.mxu2 %vm115_vm0, %v2068_v9  ;;  %v1579_v32 = vor.u32 %v1864_v30, %v1578_v29  ;;  %v1374_v33 = vld [vmem:[#allocation4 + $0x78] sm:$0xf]  ;;  %v1813_v34 = vld [vmem:[#allocation4 + $0x80] sm:$0xf0]  ;;  %v1471_v37 = vor.u32 %v1837_v28, %v1470_v25  ;;  %v1458_v38 = vld [vmem:[#allocation4 + $0x120] sm:$0xf] }
  0x18   :  { %851 = vmatpush.bf16.msra.mxu0 %v1399_v20  ;;  %879 = vmatpush.bf16.msrb.mxu2 %v1591_v24  ;;  %v1566_v35 = vld [vmem:[#allocation4 + $0x1f8] sm:$0xf]  ;;  %v1861_v36 = vld [vmem:[#allocation4 + $0x200] sm:$0xf0]  ;;  %v1834_v39 = vld [vmem:[#allocation4 + $0x128] sm:$0xf0]  ;;  %v1375_v40 = vor.u32 %v1813_v34, %v1374_v33 }
  0x19   :  { %v1567_v41 = vor.u32 %v1861_v36, %v1566_v35  ;;  %v1362_v42 = vld [vmem:[#allocation4 + $0x60] sm:$0xf]  ;;  %v1810_v43 = vld [vmem:[#allocation4 + $0x68] sm:$0xf0]  ;;  %v1686_v46 = vld [vmem:[#allocation4 + $0x2e8] sm:$0xf]  ;;  %v1459_v47 = vor.u32 %v1834_v39, %v1458_v38 }
  0x1a   :  { %v1554_v44 = vld [vmem:[#allocation4 + $0x1e0] sm:$0xf]  ;;  %v1858_v45 = vld [vmem:[#allocation4 + $0x1e8] sm:$0xf0]  ;;  %v1891_v48 = vld [vmem:[#allocation4 + $0x2f0] sm:$0xf0]  ;;  %v1363_v52 = vor.u32 %v1810_v43, %v1362_v42 }
  0x1b   :  { %866 = vmatpush.bf16.msrb.mxu1 %v1483_v23  ;;  %v1446_v49 = vld [vmem:[#allocation4 + $0x108] sm:$0xf]  ;;  %v1831_v50 = vld [vmem:[#allocation4 + $0x110] sm:$0xf0]  ;;  %v1687_v51 = vor.u32 %v1891_v48, %v1686_v46  ;;  %v1555_v53 = vor.u32 %v1858_v45, %v1554_v44  ;;  %v1674_v55 = vld [vmem:[#allocation4 + $0x2d0] sm:$0xf] }
  0x1c   :  { %852 = vmatpush.bf16.msra.mxu0 %v1387_v31  ;;  %880 = vmatpush.bf16.msrb.mxu2 %v1579_v32  ;;  %v1350_v54 = vld [vmem:[#allocation4 + $0x48] sm:$0xf]  ;;  %v1888_v56 = vld [vmem:[#allocation4 + $0x2d8] sm:$0xf0]  ;;  %v1807_v57 = vld [vmem:[#allocation4 + $0x50] sm:$0xf0]  ;;  %v1447_v61 = vor.u32 %v1831_v50, %v1446_v49 }
  0x1d   :  { %v1542_v58 = vld [vmem:[#allocation4 + $0x1c8] sm:$0xf]  ;;  %v1855_v59 = vld [vmem:[#allocation4 + $0x1d0] sm:$0xf0]  ;;  %893 = vmatpush.bf16.msra.mxu3 %v1687_v51  ;;  %v1675_v60 = vor.u32 %v1888_v56, %v1674_v55  ;;  %v1434_v62 = vld [vmem:[#allocation4 + $0xf0] sm:$0xf]  ;;  %v1351_v1 = vor.u32 %v1807_v57, %v1350_v54 }
  0x1e   :  { %v1828_v63 = vld [vmem:[#allocation4 + $0xf8] sm:$0xf0]  ;;  %v1662_v0 = vld [vmem:[#allocation4 + $0x2b8] sm:$0xf]  ;;  %v1543_v2 = vor.u32 %v1855_v59, %v1542_v58  ;;  %v1338_v3 = vld [vmem:[#allocation4 + $0x30] sm:$0xf] }
  0x1f   :  { %867 = vmatpush.bf16.msrb.mxu1 %v1471_v37  ;;  %v1885_v4 = vld [vmem:[#allocation4 + $0x2c0] sm:$0xf0]  ;;  %v1804_v5 = vld [vmem:[#allocation4 + $0x38] sm:$0xf0]  ;;  %v1530_v6 = vld [vmem:[#allocation4 + $0x1b0] sm:$0xf]  ;;  %v1435_v10 = vor.u32 %v1828_v63, %v1434_v62 }
  0x20   :  { %853 = vmatpush.bf16.msra.mxu0 %v1375_v40  ;;  %881 = vmatpush.bf16.msrb.mxu2 %v1567_v41  ;;  %v1852_v7 = vld [vmem:[#allocation4 + $0x1b8] sm:$0xf0]  ;;  %v1663_v8 = vor.u32 %v1885_v4, %v1662_v0  ;;  %v1650_v11 = vld [vmem:[#allocation4 + $0x2a0] sm:$0xf]  ;;  %v1882_v12 = vld [vmem:[#allocation4 + $0x2a8] sm:$0xf0]  ;;  %v1339_v15 = vor.u32 %v1804_v5, %v1338_v3 }
  0x21   :  { %894 = vmatpush.bf16.msra.mxu3 %v1675_v60  ;;  %v1422_v13 = vld [vmem:[#allocation4 + $0xd8] sm:$0xf]  ;;  %v1825_v14 = vld [vmem:[#allocation4 + $0xe0] sm:$0xf0]  ;;  %v1531_v16 = vor.u32 %v1852_v7, %v1530_v6  ;;  %v1651_v21 = vor.u32 %v1882_v12, %v1650_v11  ;;  %v1410_v23 = vld [vmem:[#allocation4 + $0xc0] sm:$0xf] }
  0x22   :  { %v1326_v17 = vld [vmem:[#allocation4 + $0x18] sm:$0xf]  ;;  %v1801_v18 = vld [vmem:[#allocation4 + $0x20] sm:$0xf0]  ;;  %v1423_v22 = vor.u32 %v1825_v14, %v1422_v13  ;;  %v1879_v24 = vld [vmem:[#allocation4 + $0x290] sm:$0xf0] }
  0x23   :  { %868 = vmatpush.bf16.msrb.mxu1 %v1459_v47  ;;  %v1518_v19 = vld [vmem:[#allocation4 + $0x198] sm:$0xf]  ;;  %v1849_v20 = vld [vmem:[#allocation4 + $0x1a0] sm:$0xf0]  ;;  %v1822_v25 = vld [vmem:[#allocation4 + $0xc8] sm:$0xf0]  ;;  %v1327_v28 = vor.u32 %v1801_v18, %v1326_v17 }
  0x24   :  { %854 = vmatpush.bf16.msra.mxu0 %v1363_v52  ;;  %882 = vmatpush.bf16.msrb.mxu2 %v1555_v53  ;;  %v1842_v26 = vld [vmem:[#allocation4 + $0x16c] sm:$0xf]  ;;  %v1496_v27 = vld [vmem:[#allocation4 + $0x174] sm:$0xf0]  ;;  %v1519_v29 = vor.u32 %v1849_v20, %v1518_v19  ;;  %v1314_v30 = vld [vmem:[#allocation4] sm:$0xf]  ;;  %v1411_v36 = vor.u32 %v1822_v25, %v1410_v23 }
  0x25   :  { %1311 = vmatmul.msk.bf16.vlgmr.msrb.gmra.mxu3 %vm115_vm0, %v2068_v9  ;;  %v1638_v9 = vld [vmem:[#allocation4 + $0x288] sm:$0xf]  ;;  %v1798_v31 = vld [vmem:[#allocation4 + $0x8] sm:$0xf0]  ;;  %v1506_v32 = vld [vmem:[#allocation4 + $0x180] sm:$0xf]  ;;  %v1499_v40 = vor.u32 %v1842_v26, %v1496_v27 }
  0x26   :  { %895 = vmatpush.bf16.msra.mxu3 %v1663_v8  ;;  %v1846_v33 = vld [vmem:[#allocation4 + $0x188] sm:$0xf0]  ;;  %v1639_v35 = vor.u32 %v1879_v24, %v1638_v9  ;;  %v1400_v37 = vld [vmem:[#allocation4 + $0xb4] sm:$0xf0]  ;;  %v1839_v41 = vld [vmem:[#allocation4 + $0x154] sm:$0xf]  ;;  %v1315_v43 = vor.u32 %v1798_v31, %v1314_v30 }
  0x27   :  { %869 = vmatpush.bf16.msrb.mxu1 %v1447_v61  ;;  %v1818_v34 = vld [vmem:[#allocation4 + $0xac] sm:$0xf]  ;;  %v1592_v39 = vld [vmem:[#allocation4 + $0x234] sm:$0xf0]  ;;  %v1484_v42 = vld [vmem:[#allocation4 + $0x15c] sm:$0xf0]  ;;  %v1507_v44 = vor.u32 %v1846_v33, %v1506_v32 }
  0x28   :  { %855 = vmatpush.bf16.msra.mxu0 %v1351_v1  ;;  %883 = vmatpush.bf16.msrb.mxu2 %v1543_v2  ;;  %v1866_v38 = vld [vmem:[#allocation4 + $0x22c] sm:$0xf]  ;;  %v1403_v45 = vor.u32 %v1818_v34, %v1400_v37  ;;  %v1815_v47 = vld [vmem:[#allocation4 + $0x94] sm:$0xf]  ;;  %v1388_v48 = vld [vmem:[#allocation4 + $0x9c] sm:$0xf0]  ;;  %v1487_v51 = vor.u32 %v1839_v41, %v1484_v42 }
  0x29   :  { %v1595_v46 = vor.u32 %v1866_v38, %v1592_v39  ;;  %v1863_v49 = vld [vmem:[#allocation4 + $0x214] sm:$0xf]  ;;  %v1580_v50 = vld [vmem:[#allocation4 + $0x21c] sm:$0xf0]  ;;  %v1836_v52 = vld [vmem:[#allocation4 + $0x13c] sm:$0xf]  ;;  %v1391_v54 = vor.u32 %v1815_v47, %v1388_v48 }
  0x2a   :  { %896 = vmatpush.bf16.msra.mxu3 %v1651_v21  ;;  %v1472_v53 = vld [vmem:[#allocation4 + $0x144] sm:$0xf0]  ;;  %v1583_v55 = vor.u32 %v1863_v49, %v1580_v50  ;;  %v1833_v57 = vld [vmem:[#allocation4 + $0x124] sm:$0xf]  ;;  %v1460_v58 = vld [vmem:[#allocation4 + $0x12c] sm:$0xf0] }
  0x2b   :  { %870 = vmatpush.bf16.msrb.mxu1 %v1435_v10  ;;  %v1475_v56 = vor.u32 %v1836_v52, %v1472_v53  ;;  %v1463_v59 = vor.u32 %v1833_v57, %v1460_v58  ;;  %v1626_v60 = vld [vmem:[#allocation4 + $0x270] sm:$0xf]  ;;  %v1876_v61 = vld [vmem:[#allocation4 + $0x278] sm:$0xf0]  ;;  %v1376_v0 = vld [vmem:[#allocation4 + $0x84] sm:$0xf0] }
  0x2c   :  { %856 = vmatpush.bf16.msra.mxu0 %v1339_v15  ;;  %884 = vmatpush.bf16.msrb.mxu2 %v1531_v16  ;;  %v1627_v62 = vor.u32 %v1876_v61, %v1626_v60  ;;  %v1812_v63 = vld [vmem:[#allocation4 + $0x7c] sm:$0xf]  ;;  %v1568_v3 = vld [vmem:[#allocation4 + $0x204] sm:$0xf0]  ;;  %v1830_v5 = vld [vmem:[#allocation4 + $0x10c] sm:$0xf] }
  0x2d   :  { %v1860_v1 = vld [vmem:[#allocation4 + $0x1fc] sm:$0xf]  ;;  %v1379_v2 = vor.u32 %v1812_v63, %v1376_v0  ;;  %v1448_v6 = vld [vmem:[#allocation4 + $0x114] sm:$0xf0]  ;;  %v1873_v10 = vld [vmem:[#allocation4 + $0x260] sm:$0xf0] }
  0x2e   :  { %897 = vmatpush.bf16.msra.mxu3 %v1639_v35  ;;  %v1571_v4 = vor.u32 %v1860_v1, %v1568_v3  ;;  %v1451_v7 = vor.u32 %v1830_v5, %v1448_v6  ;;  %v1614_v8 = vld [vmem:[#allocation4 + $0x258] sm:$0xf]  ;;  %v1809_v12 = vld [vmem:[#allocation4 + $0x64] sm:$0xf]  ;;  %v1364_v13 = vld [vmem:[#allocation4 + $0x6c] sm:$0xf0] }
  0x2f   :  { %871 = vmatpush.bf16.msrb.mxu1 %v1423_v22  ;;  %v1615_v11 = vor.u32 %v1873_v10, %v1614_v8  ;;  %v1367_v14 = vor.u32 %v1809_v12, %v1364_v13  ;;  %v1857_v15 = vld [vmem:[#allocation4 + $0x1e4] sm:$0xf]  ;;  %v1556_v16 = vld [vmem:[#allocation4 + $0x1ec] sm:$0xf0]  ;;  %v1827_v18 = vld [vmem:[#allocation4 + $0xf4] sm:$0xf] }
  0x30   :  { %857 = vmatpush.bf16.msra.mxu0 %v1327_v28  ;;  %885 = vmatpush.bf16.msrb.mxu2 %v1519_v29  ;;  %v1559_v17 = vor.u32 %v1857_v15, %v1556_v16  ;;  %v1436_v19 = vld [vmem:[#allocation4 + $0xfc] sm:$0xf0]  ;;  %v1870_v22 = vld [vmem:[#allocation4 + $0x248] sm:$0xf0]  ;;  %v1352_v24 = vld [vmem:[#allocation4 + $0x54] sm:$0xf0] }
  0x31   :  { %v1439_v20 = vor.u32 %v1827_v18, %v1436_v19  ;;  %v1602_v21 = vld [vmem:[#allocation4 + $0x240] sm:$0xf]  ;;  %v1806_v9 = vld [vmem:[#allocation4 + $0x4c] sm:$0xf]  ;;  %v1544_v27 = vld [vmem:[#allocation4 + $0x1d4] sm:$0xf0] }
  0x32   :  { %898 = vmatpush.bf16.msra.mxu3 %v1627_v62  ;;  %v1603_v23 = vor.u32 %v1870_v22, %v1602_v21  ;;  %v1854_v25 = vld [vmem:[#allocation4 + $0x1cc] sm:$0xf]  ;;  %v1355_v26 = vor.u32 %v1806_v9, %v1352_v24  ;;  %v1688_v30 = vld [vmem:[#allocation4 + $0x2f4] sm:$0xf0]  ;;  %v1824_v31 = vld [vmem:[#allocation4 + $0xdc] sm:$0xf] }
  0x33   :  { %872 = vmatpush.bf16.msrb.mxu1 %v1411_v36  ;;  %v1890_v28 = vld [vmem:[#allocation4 + $0x2ec] sm:$0xf]  ;;  %v1547_v29 = vor.u32 %v1854_v25, %v1544_v27  ;;  %v1424_v32 = vld [vmem:[#allocation4 + $0xe4] sm:$0xf0]  ;;  %v1803_v35 = vld [vmem:[#allocation4 + $0x34] sm:$0xf] }
  0x34   :  { %858 = vmatpush.bf16.msra.mxu0 %v1315_v43  ;;  %886 = vmatpush.bf16.msrb.mxu2 %v1507_v44  ;;  %v1691_v33 = vor.u32 %v1890_v28, %v1688_v30  ;;  %v1427_v34 = vor.u32 %v1824_v31, %v1424_v32  ;;  %v1340_v36 = vld [vmem:[#allocation4 + $0x3c] sm:$0xf0]  ;;  %v1851_v37 = vld [vmem:[#allocation4 + $0x1b4] sm:$0xf]  ;;  %v1821_v44 = vld [vmem:[#allocation4 + $0xc4] sm:$0xf] }
  0x35   :  { %v1343_v38 = vor.u32 %v1803_v35, %v1340_v36  ;;  %v1532_v39 = vld [vmem:[#allocation4 + $0x1bc] sm:$0xf0]  ;;  %v1800_v47 = vld [vmem:[#allocation4 + $0x1c] sm:$0xf]  ;;  %v1328_v48 = vld [vmem:[#allocation4 + $0x24] sm:$0xf0] }
  0x36   :  { %899 = vmatpush.bf16.msra.mxu3 %v1615_v11  ;;  %v1676_v41 = vld [vmem:[#allocation4 + $0x2dc] sm:$0xf0]  ;;  %v1535_v42 = vor.u32 %v1851_v37, %v1532_v39  ;;  %v1848_v49 = vld [vmem:[#allocation4 + $0x19c] sm:$0xf]  ;;  %v1331_v50 = vor.u32 %v1800_v47, %v1328_v48  ;;  %v1664_v53 = vld [vmem:[#allocation4 + $0x2c4] sm:$0xf0] }
  0x37   :  { %921 = vmatpush.bf16.msra.mxu1 %v1499_v40  ;;  %v1887_v40 = vld [vmem:[#allocation4 + $0x2d4] sm:$0xf]  ;;  %v1884_v52 = vld [vmem:[#allocation4 + $0x2bc] sm:$0xf]  ;;  %v1316_v57 = vld [vmem:[#allocation4 + $0xc] sm:$0xf0] }
  0x38   :  { %907 = vmatpush.bf16.msrb.mxu0 %v1403_v45  ;;  %935 = vmatpush.bf16.msra.mxu2 %v1595_v46  ;;  %v1679_v43 = vor.u32 %v1887_v40, %v1676_v41  ;;  %v1412_v45 = vld [vmem:[#allocation4 + $0xcc] sm:$0xf0]  ;;  %v1845_v58 = vld [vmem:[#allocation4 + $0x184] sm:$0xf]  ;;  %v1878_v1 = vld [vmem:[#allocation4 + $0x28c] sm:$0xf] }
  0x39   :  { %v1415_v46 = vor.u32 %v1821_v44, %v1412_v45  ;;  %v1508_v60 = vld [vmem:[#allocation4 + $0x18c] sm:$0xf0]  ;;  %v1881_v61 = vld [vmem:[#allocation4 + $0x2a4] sm:$0xf]  ;;  %v1628_v5 = vld [vmem:[#allocation4 + $0x27c] sm:$0xf0] }
  0x3a   :  { %900 = vmatpush.bf16.msra.mxu3 %v1603_v23  ;;  %v1652_v62 = vld [vmem:[#allocation4 + $0x2ac] sm:$0xf0]  ;;  %v1511_v63 = vor.u32 %v1845_v58, %v1508_v60  ;;  %v1872_v10 = vld [vmem:[#allocation4 + $0x25c] sm:$0xf]  ;;  %v1616_v11 = vld [vmem:[#allocation4 + $0x264] sm:$0xf0] }
  0x3b   :  { %922 = vmatpush.bf16.msra.mxu1 %v1487_v51  ;;  %v1520_v51 = vld [vmem:[#allocation4 + $0x1a4] sm:$0xf0]  ;;  %v1655_v0 = vor.u32 %v1881_v61, %v1652_v62  ;;  %v1619_v13 = vor.u32 %v1872_v10, %v1616_v11  ;;  %v1869_v15 = vld [vmem:[#allocation4 + $0x244] sm:$0xf]  ;;  %v1604_v16 = vld [vmem:[#allocation4 + $0x24c] sm:$0xf0] }
  0x3c   :  { %908 = vmatpush.bf16.msrb.mxu0 %v1391_v54  ;;  %936 = vmatpush.bf16.msra.mxu2 %v1583_v55  ;;  %v1523_v54 = vor.u32 %v1848_v49, %v1520_v51  ;;  %v1667_v55 = vor.u32 %v1884_v52, %v1664_v53  ;;  %v1607_v19 = vor.u32 %v1869_v15, %v1604_v16  ;;  %v1844_v27 = vld [vmem:[#allocation4 + $0x178] sm:$0xf0]  ;;  %v1841_v35 = vld [vmem:[#allocation4 + $0x160] sm:$0xf0]  ;;  %v1406_v40 = vld [vmem:[#allocation4 + $0xb0] sm:$0xf] }
  0x3d   :  { %v1868_v45 = vld [vmem:[#allocation4 + $0x238] sm:$0xf0]  ;;  %v1478_v52 = vld [vmem:[#allocation4 + $0x140] sm:$0xf]  ;;  %v1838_v53 = vld [vmem:[#allocation4 + $0x148] sm:$0xf0] }
  0x3e   :  { %949 = vmatpush.bf16.msrb.mxu3 %v1691_v33  ;;  %v1817_v58 = vld [vmem:[#allocation4 + $0xa0] sm:$0xf0]  ;;  %v1586_v60 = vld [vmem:[#allocation4 + $0x218] sm:$0xf]  ;;  %v1862_v10 = vld [vmem:[#allocation4 + $0x208] sm:$0xf0] }
  0x3f   :  { %923 = vmatpush.bf16.msra.mxu1 %v1475_v56  ;;  %v1797_v56 = vld [vmem:[#allocation4 + $0x4] sm:$0xf]  ;;  %v1832_v15 = vld [vmem:[#allocation4 + $0x118] sm:$0xf0]  ;;  %v1370_v16 = vld [vmem:[#allocation4 + $0x68] sm:$0xf] }
  0x40   :  { %909 = vmatpush.bf16.msrb.mxu0 %v1379_v2  ;;  %937 = vmatpush.bf16.msra.mxu2 %v1571_v4  ;;  %v1640_v2 = vld [vmem:[#allocation4 + $0x294] sm:$0xf0]  ;;  %v1875_v4 = vld [vmem:[#allocation4 + $0x274] sm:$0xf]  ;;  %v1865_v61 = vld [vmem:[#allocation4 + $0x220] sm:$0xf0] }
  0x41   :  { %v1643_v3 = vor.u32 %v1878_v1, %v1640_v2  ;;  %v1631_v6 = vor.u32 %v1875_v4, %v1628_v5  ;;  %v1466_v2 = vld [vmem:[#allocation4 + $0x128] sm:$0xf]  ;;  %v1587_v4 = vor.u32 %v1865_v61, %v1586_v60  ;;  %v1382_v5 = vld [vmem:[#allocation4 + $0x80] sm:$0xf]  ;;  %v1850_v61 = vld [vmem:[#allocation4 + $0x1a8] sm:$0xf0] }
  0x42   :  { %950 = vmatpush.bf16.msrb.mxu3 %v1679_v43  ;;  %v1598_v43 = vld [vmem:[#allocation4 + $0x230] sm:$0xf]  ;;  %v1526_v60 = vld [vmem:[#allocation4 + $0x1a0] sm:$0xf] }
  0x43   :  { %924 = vmatpush.bf16.msra.mxu1 %v1463_v59  ;;  %v1319_v59 = vor.u32 %v1797_v56, %v1316_v57  ;;  %v1599_v56 = vor.u32 %v1868_v45, %v1598_v43  ;;  %v1394_v57 = vld [vmem:[#allocation4 + $0x98] sm:$0xf]  ;;  %v1805_v45 = vld [vmem:[#allocation4 + $0x40] sm:$0xf0] }
  0x44   :  { %910 = vmatpush.bf16.msrb.mxu0 %v1367_v14  ;;  %938 = vmatpush.bf16.msra.mxu2 %v1559_v17  ;;  %v1395_v1 = vor.u32 %v1817_v58, %v1394_v57  ;;  %v1346_v43 = vld [vmem:[#allocation4 + $0x38] sm:$0xf]  ;;  %v1802_v58 = vld [vmem:[#allocation4 + $0x28] sm:$0xf0] }
  0x46   :  { %951 = vmatpush.bf16.msrb.mxu3 %v1667_v55 }
  0x47   :  { %925 = vmatpush.bf16.msra.mxu1 %v1451_v7  ;;  %v2081_v7 = vld [vmem:[%s2127_s2] sm:$0xf] }
  0x48   :  { %911 = vmatpush.bf16.msrb.mxu0 %v1355_v26  ;;  %939 = vmatpush.bf16.msra.mxu2 %v1547_v29  ;;  %v83_v8 = vperm.slane %v2081_v7, 1  ;;  %v84_v18 = vperm.slane %v2081_v7, 2  ;;  %v1502_v26 = vld [vmem:[#allocation4 + $0x170] sm:$0xf] }
  0x49   :  { %v1503_v33 = vor.u32 %v1844_v27, %v1502_v26  ;;  %v1358_v26 = vld [vmem:[#allocation4 + $0x50] sm:$0xf] }
  0x4a   :  { %952 = vmatpush.bf16.msrb.mxu3 %v1655_v0  ;;  %v85_v0 = vperm.slane %v2081_v7, 3 }
  0x4b   :  { %926 = vmatpush.bf16.msra.mxu1 %v1439_v20  ;;  %v82_v20 = vperm.slane %v2081_v7, 0 }
  0x4c   :  { %912 = vmatpush.bf16.msrb.mxu0 %v1343_v38  ;;  %940 = vmatpush.bf16.msra.mxu2 %v1535_v42  ;;  %v1820_v42 = vld [vmem:[#allocation4 + $0xb8] sm:$0xf0] }
  0x4d   :  { %v1407_v51 = vor.u32 %v1820_v42, %v1406_v40 }
  0x4e   :  { %953 = vmatpush.bf16.msrb.mxu3 %v1643_v3  ;;  %v1835_v3 = vld [vmem:[#allocation4 + $0x130] sm:$0xf0] }
  0x4f   :  { %927 = vmatpush.bf16.msra.mxu1 %v1427_v34  ;;  %v1490_v34 = vld [vmem:[#allocation4 + $0x158] sm:$0xf]  ;;  %v1467_v11 = vor.u32 %v1835_v3, %v1466_v2  ;;  %v1527_v2 = vor.u32 %v1850_v61, %v1526_v60  ;;  %v1322_v3 = vld [vmem:[#allocation4 + $0x8] sm:$0xf] }
  0x50   :  { %913 = vmatpush.bf16.msrb.mxu0 %v1331_v50  ;;  %941 = vmatpush.bf16.msra.mxu2 %v1523_v54  ;;  %v1491_v47 = vor.u32 %v1841_v35, %v1490_v34  ;;  %v1892_v34 = vld [vmem:[#allocation4 + $0x2f8] sm:$0xf0] }
  0x52   :  { %954 = vmatpush.bf16.msrb.mxu3 %v1631_v6  ;;  %v1814_v6 = vld [vmem:[#allocation4 + $0x88] sm:$0xf0] }
  0x53   :  { %928 = vmatpush.bf16.msra.mxu1 %v1415_v46 }
  0x54   :  { %914 = vmatpush.bf16.msrb.mxu0 %v1319_v59  ;;  %942 = vmatpush.bf16.msra.mxu2 %v1511_v63  ;;  %v1479_v63 = vor.u32 %v1838_v53, %v1478_v52  ;;  %v1823_v52 = vld [vmem:[#allocation4 + $0xd0] sm:$0xf0]  ;;  %v1347_v53 = vor.u32 %v1805_v45, %v1346_v43  ;;  %v1902_v45 = vld [vmem:[#allocation6 + $0x48] sm:$0xff] }
  0x56   :  { %955 = vmatpush.bf16.msrb.mxu3 %v1619_v13  ;;  %v1383_v13 = vor.u32 %v1814_v6, %v1382_v5  ;;  %v1799_v5 = vld [vmem:[#allocation4 + $0x10] sm:$0xf0]  ;;  %v1514_v6 = vld [vmem:[#allocation4 + $0x188] sm:$0xf] }
  0x5a   :  { %956 = vmatpush.bf16.msrb.mxu3 %v1607_v19  ;;  %v1859_v19 = vld [vmem:[#allocation4 + $0x1f0] sm:$0xf0] }
  0x93   :  { %v142_v12 = vpop.f32.mrf.mxu1 }
  0x94   :  { %v143_v14 = vadd.f32 %v142_v12, %v83_v8 }
  0x96   :  { %v184_v22 = vmul.f32 0.01, %v143_v14  ;;  %vm176_vm1 = vcmp.gt.f32.partialorder %v143_v14, 0.0 }
  0x98   :  { %v128_v17 = vpop.f32.mrf.mxu3  ;;  %v192_v29 = vsel %vm176_vm1, %v143_v14, %v184_v22  ;;  %v1454_v14 = vld [vmem:[#allocation4 + $0x110] sm:$0xf]  ;;  %v1442_v22 = vld [vmem:[#allocation4 + $0xf8] sm:$0xf] }
  0x99   :  { %v129_v25 = vadd.f32 %v128_v17, %v82_v20  ;;  %v1811_v17 = vld [vmem:[#allocation4 + $0x70] sm:$0xf0] }
  0x9a   :  { %v156_v21 = vpop.f32.mrf.mxu2 }
  0x9b   :  { %v144_v23 = vpop.f32.mrf.mxu1  ;;  %v157_v9 = vadd.f32 %v156_v21, %v84_v18  ;;  %v183_v36 = vmul.f32 0.01, %v129_v25  ;;  %vm175_vm4 = vcmp.gt.f32.partialorder %v129_v25, 0.0  ;;  %v1455_v21 = vor.u32 %v1832_v15, %v1454_v14  ;;  %v1646_v15 = vld [vmem:[#allocation4 + $0x290] sm:$0xf] }
  0x9c   :  { %v145_v24 = vadd.f32 %v144_v23, %v83_v8  ;;  %v1574_v8 = vld [vmem:[#allocation4 + $0x200] sm:$0xf] }
  0x9d   :  { %v185_v30 = vmul.f32 0.01, %v157_v9  ;;  %vm177_vm3 = vcmp.gt.f32.partialorder %v157_v9, 0.0  ;;  %v191_v49 = vsel %vm175_vm4, %v129_v25, %v183_v36  ;;  %v1575_v7 = vor.u32 %v1862_v10, %v1574_v8  ;;  %v1829_v25 = vld [vmem:[#allocation4 + $0x100] sm:$0xf0] }
  0x9e   :  { %vm180_vm2 = vcmp.gt.f32.partialorder %v145_v24, 0.0  ;;  %v188_v28 = vmul.f32 0.01, %v145_v24  ;;  %v1847_v8 = vld [vmem:[#allocation4 + $0x190] sm:$0xf0] }
  0x9f   :  { %v193_v48 = vsel %vm177_vm3, %v157_v9, %v185_v30  ;;  %v1658_v10 = vld [vmem:[#allocation4 + $0x2a8] sm:$0xf] }
  0xa0   :  { %v130_v31 = vpop.f32.mrf.mxu3  ;;  %v196_v32 = vsel %vm180_vm2, %v145_v24, %v188_v28  ;;  %v1371_v24 = vor.u32 %v1811_v17, %v1370_v16  ;;  %v1808_v28 = vld [vmem:[#allocation4 + $0x58] sm:$0xf0]  ;;  %v1634_v17 = vld [vmem:[#allocation4 + $0x278] sm:$0xf] }
  0xa1   :  { %v131_v37 = vadd.f32 %v130_v31, %v82_v20  ;;  %v2086_v39 = vpack.c.bf16 %v196_v32, %v192_v29  ;;  %v1550_v29 = vld [vmem:[#allocation4 + $0x1d0] sm:$0xf]  ;;  %v1856_v31 = vld [vmem:[#allocation4 + $0x1d8] sm:$0xf0]  ;;  %v1443_v32 = vor.u32 %v1829_v25, %v1442_v22  ;;  %v1610_v22 = vld [vmem:[#allocation4 + $0x248] sm:$0xf] }
  0xa2   :  { %v158_v38 = vpop.f32.mrf.mxu2  ;;  %v1551_v42 = vor.u32 %v1856_v31, %v1550_v29  ;;  %v1899_v25 = vld [vmem:[#allocation6 + $0x30] sm:$0xff]  ;;  %v1906_v31 = vld [vmem:[#allocation6 + $0x68] sm:$0xff] }
  0xa3   :  { %v159_v41 = vadd.f32 %v158_v38, %v84_v18  ;;  %vm179_vm5 = vcmp.gt.f32.partialorder %v131_v37, 0.0  ;;  %v187_v44 = vmul.f32 0.01, %v131_v37  ;;  %873 = vmatmul.bf16.vlgmr.msrb.gmra.mxu1 %v2086_v39  ;;  %v1562_v18 = vld [vmem:[#allocation4 + $0x1e8] sm:$0xf]  ;;  %v1907_v29 = vld [vmem:[#allocation6 + $0x70] sm:$0xff] }
  0xa4   :  { %977 = vmatpush.bf16.msrb.mxu1 %v1503_v33  ;;  %v1563_v27 = vor.u32 %v1859_v19, %v1562_v18  ;;  %v1694_v33 = vld [vmem:[#allocation4 + $0x2f0] sm:$0xf]  ;;  %v1826_v38 = vld [vmem:[#allocation4 + $0xe8] sm:$0xf0]  ;;  %v1877_v18 = vld [vmem:[#allocation4 + $0x280] sm:$0xf0] }
  0xa5   :  { %vm181_vm6 = vcmp.gt.f32.partialorder %v159_v41, 0.0  ;;  %v189_v46 = vmul.f32 0.01, %v159_v41  ;;  %v195_v50 = vsel %vm179_vm5, %v131_v37, %v187_v44  ;;  %v1430_v37 = vld [vmem:[#allocation4 + $0xe0] sm:$0xf]  ;;  %v1695_v44 = vor.u32 %v1892_v34, %v1694_v33 }
  0xa6   :  { %v2090_v54 = vpack.c.bf16 %v195_v50, %v191_v49  ;;  %v1682_v49 = vld [vmem:[#allocation4 + $0x2d8] sm:$0xf]  ;;  %v1889_v50 = vld [vmem:[#allocation4 + $0x2e0] sm:$0xf0]  ;;  %v1635_v19 = vor.u32 %v1877_v18, %v1634_v17 }
  0xa7   :  { %v197_v55 = vsel %vm181_vm6, %v159_v41, %v189_v46  ;;  %v1359_v41 = vor.u32 %v1808_v28, %v1358_v26  ;;  %v1538_v46 = vld [vmem:[#allocation4 + $0x1b8] sm:$0xf]  ;;  %v1683_v57 = vor.u32 %v1889_v50, %v1682_v49  ;;  %v1895_v28 = vld [vmem:[#allocation6 + $0x10] sm:$0xff]  ;;  %v1905_v33 = vld [vmem:[#allocation6 + $0x60] sm:$0xff] }
  0xa8   :  { %v2092_v59 = vpack.c.bf16 %v197_v55, %v193_v48  ;;  %978 = vmatpush.bf16.msrb.mxu1 %v1491_v47  ;;  %v170_v62 = vpop.f32.mrf.mxu3  ;;  %859 = vmatmul.bf16.vlgmr.msra.gmra.mxu0 %v2090_v54  ;;  %v1853_v47 = vld [vmem:[#allocation4 + $0x1c0] sm:$0xf0]  ;;  %v1431_v48 = vor.u32 %v1826_v38, %v1430_v37  ;;  %v1896_v26 = vld [vmem:[#allocation6 + $0x18] sm:$0xff] }
  0xa9   :  { %963 = vmatpush.bf16.msra.mxu0 %v1407_v51  ;;  %v171_v12 = vadd.f32 %v170_v62, %v85_v0  ;;  %v1418_v51 = vld [vmem:[#allocation4 + $0xc8] sm:$0xf]  ;;  %v1539_v55 = vor.u32 %v1853_v47, %v1538_v46  ;;  %v1901_v49 = vld [vmem:[#allocation6 + $0x40] sm:$0xff] }
  0xaa   :  { %887 = vmatmul.bf16.vlgmr.msrb.gmra.mxu2 %v2092_v59  ;;  %v1419_v62 = vor.u32 %v1823_v52, %v1418_v51  ;;  %v1914_v46 = vld [vmem:[#allocation6 + $0xa8] sm:$0xff]  ;;  %v1913_v50 = vld [vmem:[#allocation6 + $0xa0] sm:$0xff] }
  0xab   :  { %991 = vmatpush.bf16.msrb.mxu2 %v1599_v56  ;;  %v186_v23 = vmul.f32 0.01, %v171_v12  ;;  %vm178_vm7 = vcmp.gt.f32.partialorder %v171_v12, 0.0  ;;  %v1334_v56 = vld [vmem:[#allocation4 + $0x20] sm:$0xf] }
  0xac   :  { %979 = vmatpush.bf16.msrb.mxu1 %v1479_v63  ;;  %v1670_v63 = vld [vmem:[#allocation4 + $0x2c0] sm:$0xf] }
  0xad   :  { %964 = vmatpush.bf16.msra.mxu0 %v1395_v1  ;;  %v194_v35 = vsel %vm178_vm7, %v171_v12, %v186_v23  ;;  %v1335_v1 = vor.u32 %v1802_v58, %v1334_v56  ;;  %v1323_v12 = vor.u32 %v1799_v5, %v1322_v3  ;;  %v1871_v23 = vld [vmem:[#allocation4 + $0x250] sm:$0xf0]  ;;  %v1912_v56 = vld [vmem:[#allocation6 + $0x98] sm:$0xff] }
  0xaf   :  { %992 = vmatpush.bf16.msrb.mxu2 %v1587_v4 }
  0xb0   :  { %980 = vmatpush.bf16.msrb.mxu1 %v1467_v11  ;;  %v172_v20 = vpop.f32.mrf.mxu3  ;;  %v1883_v11 = vld [vmem:[#allocation4 + $0x2b0] sm:$0xf0] }
  0xb1   :  { %v173_v9 = vadd.f32 %v172_v20, %v85_v0  ;;  %965 = vmatpush.bf16.msra.mxu0 %v1383_v13  ;;  %v1886_v0 = vld [vmem:[#allocation4 + $0x2c8] sm:$0xf0]  ;;  %v1515_v13 = vor.u32 %v1847_v8, %v1514_v6  ;;  %v1659_v14 = vor.u32 %v1883_v11, %v1658_v10  ;;  %v1622_v20 = vld [vmem:[#allocation4 + $0x260] sm:$0xf] }
  0xb2   :  { %v1671_v4 = vor.u32 %v1886_v0, %v1670_v63  ;;  %v1910_v6 = vld [vmem:[#allocation6 + $0x88] sm:$0xff] }
  0xb3   :  { %993 = vmatpush.bf16.msrb.mxu2 %v1575_v7  ;;  %vm182_vm8 = vcmp.gt.f32.partialorder %v173_v9, 0.0  ;;  %v190_v30 = vmul.f32 0.01, %v173_v9  ;;  %929 = vmatmul.bf16.vlgmr.msra.gmra.mxu1 %v2086_v39  ;;  %v1880_v7 = vld [vmem:[#allocation4 + $0x298] sm:$0xf0] }
  0xb4   :  { %981 = vmatpush.bf16.msrb.mxu1 %v1455_v21  ;;  %v1647_v16 = vor.u32 %v1880_v7, %v1646_v15  ;;  %v1874_v21 = vld [vmem:[#allocation4 + $0x268] sm:$0xf0] }
  0xb5   :  { %v198_v36 = vsel %vm182_vm8, %v173_v9, %v190_v30  ;;  %966 = vmatpush.bf16.msra.mxu0 %v1371_v24  ;;  %v1611_v9 = vor.u32 %v1871_v23, %v1610_v22  ;;  %v1900_v24 = vld [vmem:[#allocation6 + $0x38] sm:$0xff]  ;;  %v1894_v30 = vld [vmem:[#allocation6 + $0x8] sm:$0xff] }
  0xb6   :  { %v2098_v40 = vpack.c.bf16 %v198_v36, %v194_v35  ;;  %v1904_v35 = vld [vmem:[#allocation6 + $0x58] sm:$0xff] }
  0xb7   :  { %994 = vmatpush.bf16.msrb.mxu2 %v1563_v27  ;;  %v1908_v27 = vld [vmem:[#allocation6 + $0x78] sm:$0xff] }
  0xb8   :  { %982 = vmatpush.bf16.msrb.mxu1 %v1443_v32  ;;  %901 = vmatmul.bf16.vlgmr.msra.gmra.mxu3 %v2098_v40  ;;  %v1893_v32 = vld [vmem:[#allocation6] sm:$0xff]  ;;  %v1916_v36 = vld [vmem:[#allocation6 + $0xb8] sm:$0xff] }
  0xb9   :  { %915 = vmatmul.bf16.vlgmr.msrb.gmra.mxu0 %v2090_v54  ;;  %1005 = vmatpush.bf16.msra.mxu3 %v1695_v44 }
  0xba   :  { %943 = vmatmul.bf16.vlgmr.msra.gmra.mxu2 %v2092_v59  ;;  %967 = vmatpush.bf16.msra.mxu0 %v1359_v41  ;;  %v1915_v41 = vld [vmem:[#allocation6 + $0xb0] sm:$0xff] }
  0xbb   :  { %995 = vmatpush.bf16.msrb.mxu2 %v1551_v42  ;;  %v2111_v42 = vld [vmem:[%s2129_s4] sm:$0x7] }
  0xbc   :  { %983 = vmatpush.bf16.msrb.mxu1 %v1431_v48  ;;  %v333_v44 = vperm.slane %v2111_v42, 0  ;;  %v334_v3 = vperm.slane %v2111_v42, 1 }
  0xbd   :  { %1006 = vmatpush.bf16.msra.mxu3 %v1683_v57 }
  0xbe   :  { %968 = vmatpush.bf16.msra.mxu0 %v1347_v53 }
  0xbf   :  { %996 = vmatpush.bf16.msrb.mxu2 %v1539_v55 }
  0xc0   :  { %984 = vmatpush.bf16.msrb.mxu1 %v1419_v62  ;;  %v1911_v62 = vld [vmem:[#allocation6 + $0x90] sm:$0xff] }
  0xc1   :  { %1007 = vmatpush.bf16.msra.mxu3 %v1671_v4 }
  0xc2   :  { %969 = vmatpush.bf16.msra.mxu0 %v1335_v1 }
  0xc3   :  { %997 = vmatpush.bf16.msrb.mxu2 %v1527_v2  ;;  %985 = vmatmul.bf16.vlgmr.msrb.gmra.mxu1 %v2086_v39  ;;  %v1623_v39 = vor.u32 %v1874_v21, %v1622_v20 }
  0xc4   :  { %1250 = vmatpush.bf16.msra.mxu1 %v1908_v27 }
  0xc5   :  { %1008 = vmatpush.bf16.msra.mxu3 %v1659_v14  ;;  %v1909_v14 = vld [vmem:[#allocation6 + $0x80] sm:$0xff] }
  0xc6   :  { %970 = vmatpush.bf16.msra.mxu0 %v1323_v12 }
  0xc7   :  { %998 = vmatpush.bf16.msrb.mxu2 %v1515_v13 }
  0xc8   :  { %957 = vmatmul.bf16.vlgmr.msrb.gmra.mxu3 %v2098_v40  ;;  %1251 = vmatpush.bf16.msra.mxu1 %v1907_v29 }
  0xc9   :  { %971 = vmatmul.bf16.vlgmr.msra.gmra.mxu0 %v2090_v54  ;;  %1009 = vmatpush.bf16.msra.mxu3 %v1647_v16  ;;  %v1898_v54 = vld [vmem:[#allocation6 + $0x28] sm:$0xff] }
  0xca   :  { %999 = vmatmul.bf16.vlgmr.msrb.gmra.mxu2 %v2092_v59  ;;  %1236 = vmatpush.bf16.msrb.mxu0 %v1900_v24  ;;  %v1897_v59 = vld [vmem:[#allocation6 + $0x20] sm:$0xff] }
  0xcb   :  { %1264 = vmatpush.bf16.msra.mxu2 %v1916_v36 }
  0xcc   :  { %1252 = vmatpush.bf16.msra.mxu1 %v1906_v31 }
  0xcd   :  { %1010 = vmatpush.bf16.msra.mxu3 %v1635_v19 }
  0xce   :  { %1237 = vmatpush.bf16.msrb.mxu0 %v1899_v25 }
  0xcf   :  { %1265 = vmatpush.bf16.msra.mxu2 %v1915_v41 }
  0xd0   :  { %1253 = vmatpush.bf16.msra.mxu1 %v1905_v33 }
  0xd1   :  { %1011 = vmatpush.bf16.msra.mxu3 %v1623_v39 }
  0xd2   :  { %1238 = vmatpush.bf16.msrb.mxu0 %v1898_v54  ;;  %v335_v54 = vperm.slane %v2111_v42, 2 }
  0xd3   :  { %1266 = vmatpush.bf16.msra.mxu2 %v1914_v46 }
  0xd4   :  { %1254 = vmatpush.bf16.msra.mxu1 %v1904_v35 }
  0xd5   :  { %1012 = vmatpush.bf16.msra.mxu3 %v1611_v9 }
  0xd6   :  { %1239 = vmatpush.bf16.msrb.mxu0 %v1897_v59 }
  0xd7   :  { %1267 = vmatpush.bf16.msra.mxu2 %v1913_v50 }
  0xd8   :  { %1013 = vmatmul.bf16.vlgmr.msra.gmra.mxu3 %v2098_v40  ;;  %v1903_v40 = vld [vmem:[#allocation6 + $0x50] sm:$0xff] }
  0xd9   :  { %1255 = vmatpush.bf16.msra.mxu1 %v1903_v40 }
  0xda   :  { %1240 = vmatpush.bf16.msrb.mxu0 %v1896_v26 }
  0xdb   :  { %1268 = vmatpush.bf16.msra.mxu2 %v1912_v56 }
  0xdd   :  { %1256 = vmatpush.bf16.msra.mxu1 %v1902_v45 }
  0xde   :  { %1241 = vmatpush.bf16.msrb.mxu0 %v1895_v28 }
  0xdf   :  { %1269 = vmatpush.bf16.msra.mxu2 %v1911_v62 }
  0xe1   :  { %1257 = vmatpush.bf16.msra.mxu1 %v1901_v49 }
  0xe2   :  { %1242 = vmatpush.bf16.msrb.mxu0 %v1894_v30 }
  0xe3   :  { %1270 = vmatpush.bf16.msra.mxu2 %v1910_v6 }
  0xe6   :  { %1243 = vmatpush.bf16.msrb.mxu0 %v1893_v32 }
  0xe7   :  { %1271 = vmatpush.bf16.msra.mxu2 %v1909_v14 }
 0x120   :  { %v874_v37 = vpop.f32.mrf.mxu1 }
 0x125   :  { %v860_v34 = vpop.f32.mrf.mxu0 }
 0x126   :  { %v861_v47 = vadd.f32 %v860_v34, %v333_v44 }
 0x128   :  { %v876_v48 = vpop.f32.mrf.mxu1  ;;  %v875_v53 = vadd.f32 %v874_v37, %v861_v47 }
 0x12d   :  { %v888_v38 = vpop.f32.mrf.mxu2  ;;  %v862_v43 = vpop.f32.mrf.mxu0 }
 0x12e   :  { %v863_v55 = vadd.f32 %v862_v43, %v333_v44  ;;  %v889_v58 = vadd.f32 %v888_v38, %v875_v53 }
 0x130   :  { %v877_v60 = vadd.f32 %v876_v48, %v863_v55  ;;  %v930_v63 = vpop.f32.mrf.mxu1 }
 0x135   :  { %v890_v51 = vpop.f32.mrf.mxu2 }
 0x136   :  { %v916_v57 = vpop.f32.mrf.mxu0  ;;  %v891_v0 = vadd.f32 %v890_v51, %v877_v60  ;;  %v1926_v51 = vld [vmem:[%s2131_s6] ss:$0 sm:$0xff] }
 0x137   :  { %v917_v11 = vadd.f32 %v916_v57, %v334_v3 }
 0x138   :  { %v932_v18 = vpop.f32.mrf.mxu1 }
 0x139   :  { %v931_v16 = vadd.f32 %v930_v63, %v917_v11 }
 0x13b   :  { %v902_v52 = vpop.f32.mrf.mxu3 }
 0x13c   :  { %v903_v61 = vadd.f32 %v902_v52, %v889_v58 }
 0x13d   :  { %v944_v1 = vpop.f32.mrf.mxu2 }
 0x13e   :  { %v1025_v4 = vmul.f32 0.01, %v903_v61  ;;  %vm1019_vm9 = vcmp.gt.f32.partialorder %v903_v61, 0.0  ;;  %v918_v10 = vpop.f32.mrf.mxu0  ;;  %v945_v20 = vadd.f32 %v944_v1, %v931_v16 }
 0x13f   :  { %v919_v17 = vadd.f32 %v918_v10, %v334_v3 }
 0x140   :  { %v1031_v12 = vsel %vm1019_vm9, %v903_v61, %v1025_v4  ;;  %v986_v26 = vpop.f32.mrf.mxu1 }
 0x141   :  { %v933_v21 = vadd.f32 %v932_v18, %v919_v17 }
 0x143   :  { %v904_v2 = vpop.f32.mrf.mxu3 }
 0x144   :  { %v905_v5 = vadd.f32 %v904_v2, %v891_v0 }
 0x145   :  { %v946_v19 = vpop.f32.mrf.mxu2 }
 0x146   :  { %vm1022_vm10 = vcmp.gt.f32.partialorder %v905_v5, 0.0  ;;  %v1028_v8 = vmul.f32 0.01, %v905_v5  ;;  %v972_v22 = vpop.f32.mrf.mxu0  ;;  %v947_v23 = vadd.f32 %v946_v19, %v933_v21 }
 0x147   :  { %v973_v31 = vadd.f32 %v972_v22, %v335_v54 }
 0x148   :  { %v1034_v13 = vsel %vm1022_vm10, %v905_v5, %v1028_v8  ;;  %v988_v37 = vpop.f32.mrf.mxu1 }
 0x149   :  { %v1037_v15 = vpack.c.bf16 %v1034_v13, %v1031_v12  ;;  %v987_v34 = vadd.f32 %v986_v26, %v973_v31 }
 0x14b   :  { %v958_v7 = vpop.f32.mrf.mxu3  ;;  %1244 = vmatmul.bf16.vlgmr.msrb.gmra.mxu0 %v1037_v15 }
 0x14c   :  { %v959_v39 = vadd.f32 %v958_v7, %v945_v20 }
 0x14d   :  { %v1000_v27 = vpop.f32.mrf.mxu2 }
 0x14e   :  { %v1026_v24 = vmul.f32 0.01, %v959_v39  ;;  %vm1020_vm11 = vcmp.gt.f32.partialorder %v959_v39, 0.0  ;;  %v974_v32 = vpop.f32.mrf.mxu0  ;;  %v1001_v36 = vadd.f32 %v1000_v27, %v987_v34 }
 0x14f   :  { %v975_v35 = vadd.f32 %v974_v32, %v335_v54 }
 0x150   :  { %v1032_v28 = vsel %vm1020_vm11, %v959_v39, %v1026_v24 }
 0x151   :  { %v989_v40 = vadd.f32 %v988_v37, %v975_v35 }
 0x153   :  { %v960_v9 = vpop.f32.mrf.mxu3 }
 0x154   :  { %v961_v25 = vadd.f32 %v960_v9, %v947_v23 }
 0x155   :  { %v1002_v38 = vpop.f32.mrf.mxu2 }
 0x156   :  { %vm1023_vm12 = vcmp.gt.f32.partialorder %v961_v25, 0.0  ;;  %v1029_v59 = vmul.f32 0.01, %v961_v25  ;;  %v1003_v43 = vadd.f32 %v1002_v38, %v989_v40 }
 0x158   :  { %v1035_v29 = vsel %vm1023_vm12, %v961_v25, %v1029_v59 }
 0x159   :  { %v1038_v30 = vpack.c.bf16 %v1035_v29, %v1032_v28 }
 0x15b   :  { %1258 = vmatmul.bf16.vlgmr.msra.gmra.mxu1 %v1038_v30  ;;  %v1014_v33 = vpop.f32.mrf.mxu3 }
 0x15c   :  { %v1015_v41 = vadd.f32 %v1014_v33, %v1001_v36 }
 0x15e   :  { %v1027_v44 = vmul.f32 0.01, %v1015_v41  ;;  %vm1021_vm13 = vcmp.gt.f32.partialorder %v1015_v41, 0.0 }
 0x160   :  { %v1033_v47 = vsel %vm1021_vm13, %v1015_v41, %v1027_v44 }
 0x163   :  { %v1016_v42 = vpop.f32.mrf.mxu3 }
 0x164   :  { %v1017_v45 = vadd.f32 %v1016_v42, %v1003_v43 }
 0x166   :  { %vm1024_vm14 = vcmp.gt.f32.partialorder %v1017_v45, 0.0  ;;  %v1030_v46 = vmul.f32 0.01, %v1017_v45 }
 0x168   :  { %v1036_v48 = vsel %vm1024_vm14, %v1017_v45, %v1030_v46 }
 0x169   :  { %v1039_v49 = vpack.c.bf16 %v1036_v48, %v1033_v47 }
 0x16b   :  { %1272 = vmatmul.bf16.vlgmr.msra.gmra.mxu2 %v1039_v49 }
 0x1c8   :  { %v1245_v50 = vpop.f32.mrf.mxu0 }
 0x1c9   :  { %v1246_v53 = vadd.f32 %v1926_v51, %v1245_v50 }
 0x1d0   :  { %v1247_v58 = vpop.f32.mrf.mxu0 }
 0x1d1   :  { %v1248_v61 = vadd.f32 %v1926_v51, %v1247_v58 }
 0x1d8   :  { %v1259_v52 = vpop.f32.mrf.mxu1 }
 0x1d9   :  { %v1260_v55 = vadd.f32 %v1259_v52, %v1246_v53 }
 0x1e0   :  { %v1261_v60 = vpop.f32.mrf.mxu1 }
 0x1e1   :  { %v1262_v62 = vadd.f32 %v1261_v60, %v1248_v61 }
 0x1ee   :  { %v1273_v56 = vpop.f32.mrf.mxu2 }
 0x1ef   :  { %v1274_v57 = vadd.f32 %v1273_v56, %v1260_v55 }
 0x1f1   :  { %1927 = vtanh.f32 %v1274_v57 }
 0x1f6   :  { %v1275_v63 = vpop.f32.mrf.mxu2 }
 0x1f7   :  { %v1928_v0 = vpop.eup %1927  ;;  %v1276_v1 = vadd.f32 %v1275_v63, %v1262_v62 }
 0x1f8   :  { %1280 = vst [vmem:[%s2132_s7] sm:$0xff] %v1928_v0 }
 0x1f9   :  { %1929 = vtanh.f32 %v1276_v1 }
 0x1ff   :  { %v1930_v2 = vpop.eup %1929 }
 0x200   :  { %1281 = vst [vmem:[%s2132_s7 + $0x8] sm:$0xff] %v1930_v2 }
 0x201   :  { %1286 = vsyncpa [#allocation3], 1 }
 0x202   :  { %1287 = vsyncpa [#allocation5], 1 }

</bundles_post_ra>
